<compile_context>
chip_gen: v7x
topology: tpu7x:2x2x1
jax: 0.10.0
libtpu: 0.0.40
codegen_flags: <defaults>
</compile_context>

<pallas_src>
import math

import jax
import jax.numpy as jnp
from jax.experimental import pallas as pl
from jax.experimental.pallas import tpu as pltpu


def _build_pe(d_model: int, max_len: int) -> jnp.ndarray:
    """Sin/cos positional-encoding table, shape (max_len, d_model), f32.

    Mirrors the PyTorch buffer `pe` with the singleton batch axis squeezed.
    Handles odd d_model gracefully (cos gets floor(d/2) columns).
    """
    position = jnp.arange(max_len, dtype=jnp.float32)[:, None]          # (max_len, 1)
    div_term = jnp.exp(
        jnp.arange(0, d_model, 2, dtype=jnp.float32)
        * (-math.log(10000.0) / d_model)
    )                                                                   # (ceil(d/2),)
    angles = position * div_term                                        # (max_len, ceil(d/2))
    pe = jnp.zeros((max_len, d_model), dtype=jnp.float32)
    pe = pe.at[:, 0::2].set(jnp.sin(angles))
    pe = pe.at[:, 1::2].set(jnp.cos(angles[:, : d_model // 2]))
    return pe


def _pe_add_kernel(x_ref, pe_ref, o_ref):
    # x_ref: (TB, TL); pe_ref: (1, TL) broadcast over the sublane (batch) axis.
    o_ref[...] = (x_ref[...] + pe_ref[...]).astype(o_ref.dtype)


def _largest_aligned_divisor(n: int, unit: int, cap: int) -> int:
    """Largest multiple of `unit` that exactly divides n and is <= cap.

    Requires n % unit == 0.  Always succeeds (falls back to `unit`).
    """
    m = n // unit
    cap_m = max(1, min(m, cap // unit))
    for d in range(cap_m, 0, -1):
        if m % d == 0:
            return d * unit
    return unit


def positional_encoding_forward(
    x: jnp.ndarray,
    pe_table: jnp.ndarray,
    *,
    block_byte_budget: int = 4 << 20,   # ~4 MiB of x (and out) per block
    max_sublane_tile: int = 256,        # cap on batch rows per block
    max_lane_tile: int | None = None,   # optional cap on lanes per block
    donate_x: bool = False,             # alias x's HBM buffer as the output
) -> jnp.ndarray:
    """x: (batch, seq_len, d_model); pe_table: (max_len, d_model) f32."""
    orig_batch, seq_len, d_model = x.shape
    L = seq_len * d_model
    itemsize = jnp.dtype(x.dtype).itemsize

    # --- Parameter glue in plain JAX: slice, flatten, match activation dtype.
    pe_row = pe_table[:seq_len].reshape(1, L).astype(x.dtype)
    xf = x.reshape(orig_batch, L)
    batch = orig_batch

    # Pad the flattened lane axis up to a multiple of 128 so every tile is a
    # full lane-dense tile (unmasked stores) and block sizes stay bounded for
    # arbitrary seq_len/d_model.  Padded columns are sliced off afterwards.
    L_pad = ((L + 127) // 128) * 128
    if L_pad != L:
        xf = jnp.pad(xf, ((0, 0), (0, L_pad - L)))
        pe_row = jnp.pad(pe_row, ((0, 0), (0, L_pad - L)))

    # Pad batch to a multiple of 8 only when a full-extent batch block could
    # not fit the byte budget even at the minimum 128-wide lane tile
    # (rare: huge, non-8-aligned batch).  Typical small batches stay unpadded.
    if batch % 8 != 0 and batch * 128 * itemsize > block_byte_budget:
        b_pad = ((batch + 7) // 8) * 8
        xf = jnp.pad(xf, ((0, b_pad - batch), (0, 0)))
        batch = b_pad

    # --- Tile selection: exact divisors of the (padded) extents, sized from a
    # per-block byte budget so small-batch shapes still get large blocks.
    if batch % 8 == 0:
        cap_tb = min(max_sublane_tile,
                     max(8, block_byte_budget // (128 * itemsize)))
        tb = _largest_aligned_divisor(batch, 8, cap_tb)
    else:
        tb = batch  # full extent (valid even if not a multiple of 8)

    cap_tl = max(128, block_byte_budget // (tb * itemsize))
    if max_lane_tile is not None:
        cap_tl = min(cap_tl, max_lane_tile)
    cap_tl = max(128, (cap_tl // 128) * 128)
    tl = _largest_aligned_divisor(L_pad, 128, cap_tl)

    grid_l = L_pad // tl
    grid_b = batch // tb

    # Megacore friendliness (v7x: 2 TensorCores): if a non-trivial problem
    # collapsed to a single grid step, split the lane axis so the "parallel"
    # axis has >= 2 iterations to shard.  Tiny problems stay at (1, 1).
    MIN_SPLIT_BLOCK_BYTES = 1 << 20
    if grid_l * grid_b == 1 and tl >= 256:
        half = _largest_aligned_divisor(L_pad, 128, tl // 2)
        if half < tl and tb * half * itemsize >= MIN_SPLIT_BLOCK_BYTES:
            tl = half
            grid_l = L_pad // tl

    # --- VMEM budget: x + out double-buffered blocks + resident PE tiles,
    # plus headroom.  Capped at 48 MiB (fits v5e/v6e 128 MiB and v7x 64 MiB).
    block_bytes = tb * tl * itemsize
    pe_block_bytes = 8 * tl * itemsize          # (1, tl) sublane-padded to 8
    vmem_est = 2 * 2 * block_bytes + 2 * pe_block_bytes
    vmem_limit = int(min(max(vmem_est + (4 << 20), 16 << 20), 48 << 20))

    call_kwargs = {}
    if donate_x:
        # Reuse x's HBM buffer for the output (caller must not need x after).
        call_kwargs["input_output_aliases"] = {0: 0}

    out = pl.pallas_call(
        _pe_add_kernel,
        out_shape=jax.ShapeDtypeStruct((batch, L_pad), x.dtype),
        grid_spec=pltpu.PrefetchScalarGridSpec(
            num_scalar_prefetch=0,
            grid=(grid_l, grid_b),   # batch innermost -> PE tile stays resident
            in_specs=[
                pl.BlockSpec((tb, tl), lambda l, b: (b, l)),   # x
                pl.BlockSpec((1, tl), lambda l, b: (0, l)),    # pe
            ],
            out_specs=pl.BlockSpec((tb, tl), lambda l, b: (b, l)),
        ),
        compiler_params=pltpu.CompilerParams(
            dimension_semantics=("parallel", "parallel"),
            vmem_limit_bytes=vmem_limit,
        ),
        **call_kwargs,
    )(xf, pe_row)

    out = out[:orig_batch, :L].reshape(orig_batch, seq_len, d_model)
    return out


if __name__ == "__main__":
    key = jax.random.PRNGKey(0)
    k1, k2, k3 = jax.random.split(key, 3)

    # Case 1: primary small case consistent with the module (batch, seq, d_model).
    batch, seq_len, d_model = 2, 8, 32
    max_len = 64  # module default is 5000; small synthetic table here
    pe_table = _build_pe(d_model, max_len)

    x = jax.random.normal(k1, (batch, seq_len, d_model), dtype=jnp.float32)
    out = jax.block_until_ready(positional_encoding_forward(x, pe_table))

    ref = x + pe_table[:seq_len][None, :, :]
    assert out.shape == x.shape and out.dtype == x.dtype
    assert jnp.allclose(out, ref, atol=1e-6, rtol=1e-6)

    # Case 2: small tile caps to exercise the multi-tile grid (2 lane tiles x
    # 2 batch tiles) and PE residency across batch tiles.
    b2, s2, d2 = 16, 8, 32
    x2 = jax.random.normal(k2, (b2, s2, d2), dtype=jnp.float32)
    out2 = jax.block_until_ready(
        positional_encoding_forward(
            x2, pe_table, max_lane_tile=128, max_sublane_tile=8
        )
    )
    ref2 = x2 + pe_table[:s2][None, :, :]
    assert out2.shape == x2.shape and out2.dtype == x2.dtype
    assert jnp.allclose(out2, ref2, atol=1e-6, rtol=1e-6)

    # Case 3: odd d_model -> L % 128 != 0 exercises the lane-padding path.
    b3, s3, d3 = 2, 8, 33
    pe_table3 = _build_pe(d3, max_len)
    x3 = jax.random.normal(k3, (b3, s3, d3), dtype=jnp.float32)
    out3 = jax.block_until_ready(positional_encoding_forward(x3, pe_table3))
    ref3 = x3 + pe_table3[:s3][None, :, :]
    assert out3.shape == x3.shape and out3.dtype == x3.dtype
    assert jnp.allclose(out3, ref3, atol=1e-6, rtol=1e-6)

    print("KERNEL_OK")
</pallas_src>

<mosaic_0001>
module attributes {stable_mosaic.version = 11 : i64} {
  func.func @_pe_add_kernel(%arg0: i32, %arg1: i32, %arg2: memref<2x256xf32, #tpu.memory_space<vmem>>, %arg3: memref<1x256xf32, #tpu.memory_space<vmem>>, %arg4: memref<2x256xf32, #tpu.memory_space<vmem>>) attributes {dimension_semantics = [#tpu.dimension_semantics<parallel>, #tpu.dimension_semantics<parallel>], iteration_bounds = array<i64: 1, 1>, scalar_prefetch = 0 : i64, scratch_operands = 0 : i64, tpu.core_type = #tpu.core_type<tc>, window_params = [{transform_indices = @transform_0, window_bounds = array<i64: 2, 256>}, {transform_indices = @transform_1, window_bounds = array<i64: 1, 256>}, {transform_indices = @transform_2, window_bounds = array<i64: 2, 256>}]} {
    %c0 = arith.constant 0 : index
    %c0_0 = arith.constant 0 : index
    %0 = vector.load %arg2[%c0, %c0_0] : memref<2x256xf32, #tpu.memory_space<vmem>>, vector<2x256xf32>
    %c0_1 = arith.constant 0 : index
    %c0_2 = arith.constant 0 : index
    %1 = vector.load %arg3[%c0_1, %c0_2] : memref<1x256xf32, #tpu.memory_space<vmem>>, vector<1x256xf32>
    %2 = vector.broadcast %1 : vector<1x256xf32> to vector<2x256xf32>
    %3 = arith.addf %0, %2 : vector<2x256xf32>
    %c0_3 = arith.constant 0 : index
    %c0_4 = arith.constant 0 : index
    %4 = vector.load %arg4[%c0_3, %c0_4] : memref<2x256xf32, #tpu.memory_space<vmem>>, vector<2x256xf32>
    tpu.vector_store %arg4[%c0_3, %c0_4], %3 {strides = array<i32>} : memref<2x256xf32, #tpu.memory_space<vmem>>, vector<2x256xf32>,
    return
  }
  func.func @transform_0(%arg0: i32, %arg1: i32) -> (i32, i32) {
    %c0_i32 = arith.constant 0 : i32
    return %arg1, %arg0 : i32, i32
  }
  func.func @transform_1(%arg0: i32, %arg1: i32) -> (i32, i32) {
    %c0_i32 = arith.constant 0 : i32
    %c0_i32_0 = arith.constant 0 : i32
    return %c0_i32, %arg0 : i32, i32
  }
  func.func @transform_2(%arg0: i32, %arg1: i32) -> (i32, i32) {
    %c0_i32 = arith.constant 0 : i32
    return %arg1, %arg0 : i32, i32
  }
}

</mosaic_0001>

<bundles_post_ra>
// kernel: tpu_custom_call.1
= control target key start
LH: loop header
LB: loop body
LE: loop exit
PB: predicated region body
PF: predicated region fallthrough
CT: control target
= control target key end

     0   :  { %7 = vsyncpa [#allocation3], 0  ;;  %s157_s0 = inlined_call_operand.hbm [shape: f32[2,256], index: 0, kind: input, shape index: {}]   ;;  %s158_s1 = inlined_call_operand.vmem [shape: f32[1,256], index: 1, kind: input, shape index: {}]   ;;  %s159_s2 = inlined_call_operand.hbm [shape: f32[2,256], index: 2, kind: output, shape index: {}]  }
   0x1   :  { %8 = vsyncpa [#allocation4], 0  ;;  %s112_s9 = smov [#allocation2]   ;;  %s64_s13 = scalar_lea.hbm %s157_s0, 64 }
   0x2   :  { %s15_s10 = sshll.u32 %s112_s9, 4  ;;  %p65_p0 = scmp.ne.s32.totalorder %s157_s0, %s64_s13  ;;  %s16_s10 = int_to_ptr.vmem [resolvable:$true] %s15_s10 }
   0x3   :  { %p68_p1 = scmp.lt.u32.totalorder %s64_s13, %s157_s0 }
   0x5   :  { %p70_p2 = pnand %p68_p1, %p65_p0 }
   0x7   :  { %73 = shalt.err (!%p70_p2)
}
   0x8   :  { %s74_s18 = scalar_lea.vmem %s16_s10, 64  ;;  %p79_p4 = scmp.lt.s32.totalorder %s16_s10, %s16_s10 }
   0x9   :  { %p75_p3 = scmp.ne.s32.totalorder %s16_s10, %s74_s18  ;;  %p80_p5 = scmp.lt.s32.totalorder %s74_s18, %s74_s18 }
   0xb   :  { %p81_p6 = por %p80_p5, %p79_p4 }
   0xd   :  { %p82_p7 = pnand %p81_p6, %p75_p3 }
   0xf   :  { %85 = shalt.err (!%p82_p7)
}
  0x10   :  { %18 = dma.hbm_to_vmem [thread:$0]  %s157_s0, 64, %s16_s10, [#allocation3]  }
  0x11   :  { %108 = dma.done.wait [#allocation3], 64  }
  0x12   :  { %109 = vsyncadd [#allocation3], 4294967232  ;;  %v27_v0 = vlaneseq  ;;  %v113_v1 = vmov 1983009808   ;;  %v25_v7 = vld [vmem:[%s158_s1] sm:$0x3] }
  0x13   :  { %v37_v2 = vunpack.c.l.s4 %v113_v1  ;;  %v24_v12 = vld [vmem:[#allocation2] sm:$0xf]  ;;  %s114_s23 = smov [#allocation5]  }
  0x14   :  { %v28_v3 = vshrl.u32 %v27_v0, 7  ;;  %s52_s0 = sshll.u32 %s114_s23, 4  ;;  %s53_s0 = int_to_ptr.vmem [resolvable:$true] %s52_s0 }
  0x15   :  { %v38_v6 = vunpack.c.0.s8 %v37_v2  ;;  %s86_s24 = scalar_lea.vmem %s53_s0, 64  ;;  %p91_p9 = scmp.lt.s32.totalorder %s53_s0, %s53_s0 }
  0x16   :  { %v29_v4 = vsub.s32 0, %v28_v3  ;;  %v33_v5 = vsub.s32 1, %v28_v3  ;;  %p87_p8 = scmp.ne.s32.totalorder %s53_s0, %s86_s24  ;;  %p92_p10 = scmp.lt.s32.totalorder %s86_s24, %s86_s24 }
  0x17   :  { %v41_v10 = vsub.s32 %v38_v6, %v28_v3 }
  0x18   :  { %v30_v8 = vrot.slane %v25_v7, %v29_v4  ;;  %v34_v9 = vrot.slane %v25_v7, %v33_v5  ;;  %p93_p11 = por %p92_p10, %p91_p9 }
  0x1a   :  { %v35_v11 = vcombine.low %v30_v8, %v34_v9  ;;  %p94_p12 = pnand %p93_p11, %p87_p8 }
  0x1c   :  { %v42_v13 = vrot.slane %v35_v11, %v41_v10 }
  0x1e   :  { %v44_v14 = vadd.f32 %v42_v13, %v24_v12 }
  0x20   :  { %45 = vst [vmem:[#allocation5] sm:$0xf] %v44_v14 }
  0x21   :  { %97 = shalt.err (!%p94_p12)
}
  0x22   :  { %s98_s26 = scalar_lea.hbm %s159_s2, 64 }
  0x23   :  { %p99_p13 = scmp.ne.s32.totalorder %s159_s2, %s98_s26  ;;  %p102_p0 = scmp.lt.u32.totalorder %s98_s26, %s159_s2 }
  0x25   :  { %p104_p1 = pnand %p102_p0, %p99_p13 }
  0x27   :  { %107 = shalt.err (!%p104_p1)
}
  0x28   :  { %55 = dma.vmem_to_hbm [thread:$0]  %s53_s0, 64, %s159_s2, [#allocation4]  }
  0x29   :  { %110 = dma.done.wait [#allocation4], 64  }
  0x2a   :  { %111 = vsyncadd [#allocation4], 4294967232 }
  0x2b   :  { %59 = vsyncpa [#allocation3], 1 }
  0x2c   :  { %60 = vsyncpa [#allocation4], 1 }

</bundles_post_ra>
